<compile_context>
chip_gen: v7x
topology: tpu7x:2x2x1
jax: 0.10.0
libtpu: 0.0.40
codegen_flags: <defaults>
</compile_context>

<pallas_src>
import functools

import numpy as np

import jax
import jax.numpy as jnp
from jax.experimental import pallas as pl
from jax.experimental.pallas import tpu as pltpu


def _head_kernel_vpu(x_ref, w_ref, b_ref, o_ref, *, c_in, c_out, apply_softmax):
    """1x1 conv (+ fused channel softmax) on packed (sub, 128) spatial slabs.

    x_ref: (C_in, S, 128) f32 VMEM    w_ref: (C_out, C_in) f32 SMEM
    b_ref: (C_out,)       f32 SMEM    o_ref: (C_out, S, 128)   VMEM
    """
    # Load each input channel once as a dense (S, 128) slab (full vregs).
    xs = [x_ref[c].astype(jnp.float32) for c in range(c_in)]

    rows = []
    for o in range(c_out):                       # small, statically unrolled
        acc = xs[0] * w_ref[o, 0]
        for c in range(1, c_in):
            acc = acc + xs[c] * w_ref[o, c]
        rows.append(acc + b_ref[o])

    if apply_softmax:                            # per-pixel; no cross-lane reduce
        m = rows[0]
        for r in rows[1:]:
            m = jnp.maximum(m, r)
        exps = [jnp.exp(r - m) for r in rows]
        denom = exps[0]
        for e in exps[1:]:
            denom = denom + e
        inv = pl.reciprocal(denom, approx=True)  # EUP slot, ~free
        rows = [e * inv for e in exps]

    for o in range(c_out):                       # dense, unmasked stores
        o_ref[o] = rows[o].astype(o_ref.dtype)


def _head_kernel_mxu(x_ref, w_ref, b_ref, o_ref, *, apply_softmax):
    """1x1 conv (+ fused channel softmax) via the MXU on a lane-dense tile.

    x_ref: (C_in, T)  w_ref: (C_out, C_in)  b_ref: (C_out, 1)  o_ref: (C_out, T)
    """
    logits = jnp.dot(w_ref[...].astype(jnp.float32),
                     x_ref[...].astype(jnp.float32),
                     preferred_element_type=jnp.float32) + b_ref[...]
    if apply_softmax:
        m = jnp.max(logits, axis=0, keepdims=True)
        e = jnp.exp(logits - m)
        denom = jnp.sum(e, axis=0, keepdims=True)
        logits = e * pl.reciprocal(denom, approx=True)
    o_ref[...] = logits.astype(o_ref.dtype)


def outconv_softmax_head(x_nchw, weight, bias, *, apply_softmax=True,
                         block_hw=131072, use_mxu=None, out_dtype=None):
    """OutConv (nn.Conv2d(C_in, C_out, 1)) + optional Softmax(dim=1), fused.

    x_nchw: (N, C_in, H, W)    weight: (C_out, C_in, 1, 1)    bias: (C_out,)
    Returns (N, C_out, H, W) in `out_dtype` (defaults to x's dtype).
    """
    N, C_in, H, W = x_nchw.shape
    C_out = weight.shape[0]
    HW = H * W
    out_dtype = x_nchw.dtype if out_dtype is None else out_dtype

    x_bytes = np.dtype(x_nchw.dtype).itemsize
    o_bytes = np.dtype(out_dtype).itemsize

    if use_mxu is None:
        # HBM-bound kernel: the MXU is idle anyway, so use it for anything but
        # the truly tiny OutConv channel counts, where packed broadcast-FMAs
        # beat per-256-column MXU weight reloads.
        use_mxu = max(C_in, C_out) > 8
    # The packed 4D layout needs a free lane split of the spatial axis.
    use_packed_vpu = (not use_mxu) and (HW % 128 == 0)

    # ---- spatial tile selection -------------------------------------------
    g = 1024 if use_packed_vpu else 128          # keep full (8,128) vreg tiles
    per_pixel_bytes = C_in * x_bytes + C_out * o_bytes
    vmem_budget = 24 * 1024 * 1024               # double-buffered in+out blocks
    max_t = max(g, (vmem_budget // (2 * per_pixel_bytes)) // g * g)

    if HW < g:
        t_hw = HW                                # single full-extent block
    else:
        t_hw = min(int(block_hw), max_t, (HW // g) * g)
        t_hw = max(g, (t_hw // g) * g)
        # Megacore (v7x has 2 TCs): keep >= 2 parallel grid steps when possible.
        if N * pl.cdiv(HW, t_hw) < 2 and HW >= 2 * g:
            t_hw = max(g, (pl.cdiv(HW, 2) // g) * g)
    grid = (N, pl.cdiv(HW, t_hw))

    cost = pl.CostEstimate(
        flops=2 * N * HW * C_in * C_out + (5 * N * HW * C_out if apply_softmax else 0),
        transcendentals=(N * HW * C_out) if apply_softmax else 0,
        bytes_accessed=N * HW * per_pixel_bytes + x_bytes * (C_out * C_in + C_out),
    )
    vmem_limit = int(min(48 * 1024 * 1024,
                         max(16 * 1024 * 1024,
                             2 * t_hw * per_pixel_bytes + 2 * 1024 * 1024)))
    cparams = pltpu.CompilerParams(
        dimension_semantics=("parallel", "parallel"),
        vmem_limit_bytes=vmem_limit,
    )

    w2 = weight.reshape(C_out, C_in)             # free reshape

    if use_packed_vpu:
        S = HW // 128
        t_s = t_hw // 128
        x4 = x_nchw.reshape(N, C_in, S, 128)     # free: contiguous lane split
        kernel = functools.partial(_head_kernel_vpu, c_in=C_in, c_out=C_out,
                                   apply_softmax=apply_softmax)
        out = pl.pallas_call(
            kernel,
            out_shape=jax.ShapeDtypeStruct((N, C_out, S, 128), out_dtype),
            grid=grid,
            in_specs=[
                pl.BlockSpec((None, C_in, t_s, 128), lambda n, t: (n, 0, t, 0)),
                pl.BlockSpec(memory_space=pltpu.MemorySpace.SMEM),  # weights
                pl.BlockSpec(memory_space=pltpu.MemorySpace.SMEM),  # bias
            ],
            out_specs=pl.BlockSpec((None, C_out, t_s, 128),
                                   lambda n, t: (n, 0, t, 0)),
            compiler_params=cparams,
            cost_estimate=cost,
        )(x4, w2, bias)
    else:
        x3 = x_nchw.reshape(N, C_in, HW)         # free metadata reshape
        kernel = functools.partial(_head_kernel_mxu, apply_softmax=apply_softmax)
        out = pl.pallas_call(
            kernel,
            out_shape=jax.ShapeDtypeStruct((N, C_out, HW), out_dtype),
            grid=grid,
            in_specs=[
                pl.BlockSpec((None, C_in, t_hw), lambda n, t: (n, 0, t)),
                pl.BlockSpec((C_out, C_in), lambda n, t: (0, 0)),
                pl.BlockSpec((C_out, 1), lambda n, t: (0, 0)),
            ],
            out_specs=pl.BlockSpec((None, C_out, t_hw), lambda n, t: (n, 0, t)),
            compiler_params=cparams,
            cost_estimate=cost,
        )(x3, w2, bias.reshape(C_out, 1))

    return out.reshape(N, C_out, H, W)


if __name__ == "__main__":
    key = jax.random.PRNGKey(0)
    k_x, k_w, k_b = jax.random.split(key, 3)

    # outc of Unet_Decoder(n_channels=128, n_classes=3): C_in = 128//32 = 4, C_out = 3.
    N, C_in, C_out, Hs, Ws = 2, 4, 3, 16, 16

    x = jax.random.normal(k_x, (N, C_in, Hs, Ws), dtype=jnp.float32)
    weight = jax.random.normal(k_w, (C_out, C_in, 1, 1), dtype=jnp.float32) * 0.1
    bias = jax.random.normal(k_b, (C_out,), dtype=jnp.float32) * 0.1

    def ref_logits(xx):
        return (jnp.einsum("nchw,oc->nohw", xx, weight.reshape(C_out, C_in),
                           precision=jax.lax.Precision.HIGHEST)
                + bias.reshape(1, C_out, 1, 1))

    y_ref = jax.nn.softmax(ref_logits(x), axis=1)

    # 1) Default head: packed-(8,128)-slab VPU path, fused channel softmax.
    y = jax.block_until_ready(outconv_softmax_head(x, weight, bias))
    assert y.shape == (N, C_out, Hs, Ws)
    assert jnp.allclose(y, y_ref, atol=2e-3, rtol=2e-3)

    # 2) MXU path (default for larger channel counts).
    y2 = jax.block_until_ready(outconv_softmax_head(x, weight, bias, use_mxu=True))
    assert jnp.allclose(y2, y_ref, atol=2e-3, rtol=2e-3)

    # 3) Conv-only with a non-divisible spatial size: exercises the in-kernel
    #    masked partial tail (no wrapper-side pad / slice anymore).
    x_odd = jax.random.normal(k_x, (N, C_in, 10, 13), dtype=jnp.float32)
    y3 = jax.block_until_ready(
        outconv_softmax_head(x_odd, weight, bias, apply_softmax=False,
                             block_hw=128))
    assert jnp.allclose(y3, ref_logits(x_odd), atol=1e-4, rtol=1e-4)

    print("KERNEL_OK")
</pallas_src>

<mosaic_0001>
module attributes {stable_mosaic.version = 11 : i64} {
  func.func @_head_kernel_vpu(%arg0: i32, %arg1: i32, %arg2: memref<1x4x2x128xf32, #tpu.memory_space<vmem>>, %arg3: memref<3x4xf32, #tpu.memory_space<smem>>, %arg4: memref<3xf32, #tpu.memory_space<smem>>, %arg5: memref<1x3x2x128xf32, #tpu.memory_space<vmem>>) attributes {dimension_semantics = [#tpu.dimension_semantics<parallel>, #tpu.dimension_semantics<parallel>], iteration_bounds = array<i64: 2, 1>, scalar_prefetch = 0 : i64, scratch_operands = 0 : i64, tpu.core_type = #tpu.core_type<tc>, window_params = [{transform_indices = @transform_0, window_bounds = array<i64: 1, 4, 2, 128>}, {transform_indices = @transform_1, window_bounds = array<i64: 3, 4>}, {transform_indices = @transform_2, window_bounds = array<i64: 3>}, {transform_indices = @transform_3, window_bounds = array<i64: 1, 3, 2, 128>}]} {
    %c0 = arith.constant 0 : index
    %c0_0 = arith.constant 0 : index
    %c0_1 = arith.constant 0 : index
    %c0_2 = arith.constant 0 : index
    %0 = vector.load %arg2[%c0, %c0_0, %c0_1, %c0_2] : memref<1x4x2x128xf32, #tpu.memory_space<vmem>>, vector<1x1x2x128xf32>
    %1 = vector.shape_cast %0 : vector<1x1x2x128xf32> to vector<2x128xf32>
    %c0_3 = arith.constant 0 : index
    %c1 = arith.constant 1 : index
    %c0_4 = arith.constant 0 : index
    %c0_5 = arith.constant 0 : index
    %2 = vector.load %arg2[%c0_3, %c1, %c0_4, %c0_5] : memref<1x4x2x128xf32, #tpu.memory_space<vmem>>, vector<1x1x2x128xf32>
    %3 = vector.shape_cast %2 : vector<1x1x2x128xf32> to vector<2x128xf32>
    %c0_6 = arith.constant 0 : index
    %c2 = arith.constant 2 : index
    %c0_7 = arith.constant 0 : index
    %c0_8 = arith.constant 0 : index
    %4 = vector.load %arg2[%c0_6, %c2, %c0_7, %c0_8] : memref<1x4x2x128xf32, #tpu.memory_space<vmem>>, vector<1x1x2x128xf32>
    %5 = vector.shape_cast %4 : vector<1x1x2x128xf32> to vector<2x128xf32>
    %c0_9 = arith.constant 0 : index
    %c3 = arith.constant 3 : index
    %c0_10 = arith.constant 0 : index
    %c0_11 = arith.constant 0 : index
    %6 = vector.load %arg2[%c0_9, %c3, %c0_10, %c0_11] : memref<1x4x2x128xf32, #tpu.memory_space<vmem>>, vector<1x1x2x128xf32>
    %7 = vector.shape_cast %6 : vector<1x1x2x128xf32> to vector<2x128xf32>
    %c0_12 = arith.constant 0 : index
    %c0_13 = arith.constant 0 : index
    %8 = memref.load %arg3[%c0_12, %c0_13] : memref<3x4xf32, #tpu.memory_space<smem>>
    %9 = vector.broadcast %8 : f32 to vector<2x128xf32>
    %10 = arith.mulf %1, %9 : vector<2x128xf32>
    %c0_14 = arith.constant 0 : index
    %c1_15 = arith.constant 1 : index
    %11 = memref.load %arg3[%c0_14, %c1_15] : memref<3x4xf32, #tpu.memory_space<smem>>
    %12 = vector.broadcast %11 : f32 to vector<2x128xf32>
    %13 = arith.mulf %3, %12 : vector<2x128xf32>
    %14 = arith.addf %10, %13 : vector<2x128xf32>
    %c0_16 = arith.constant 0 : index
    %c2_17 = arith.constant 2 : index
    %15 = memref.load %arg3[%c0_16, %c2_17] : memref<3x4xf32, #tpu.memory_space<smem>>
    %16 = vector.broadcast %15 : f32 to vector<2x128xf32>
    %17 = arith.mulf %5, %16 : vector<2x128xf32>
    %18 = arith.addf %14, %17 : vector<2x128xf32>
    %c0_18 = arith.constant 0 : index
    %c3_19 = arith.constant 3 : index
    %19 = memref.load %arg3[%c0_18, %c3_19] : memref<3x4xf32, #tpu.memory_space<smem>>
    %20 = vector.broadcast %19 : f32 to vector<2x128xf32>
    %21 = arith.mulf %7, %20 : vector<2x128xf32>
    %22 = arith.addf %18, %21 : vector<2x128xf32>
    %c0_20 = arith.constant 0 : index
    %23 = memref.load %arg4[%c0_20] : memref<3xf32, #tpu.memory_space<smem>>
    %24 = vector.broadcast %23 : f32 to vector<2x128xf32>
    %25 = arith.addf %22, %24 : vector<2x128xf32>
    %c1_21 = arith.constant 1 : index
    %c0_22 = arith.constant 0 : index
    %26 = memref.load %arg3[%c1_21, %c0_22] : memref<3x4xf32, #tpu.memory_space<smem>>
    %27 = vector.broadcast %26 : f32 to vector<2x128xf32>
    %28 = arith.mulf %1, %27 : vector<2x128xf32>
    %c1_23 = arith.constant 1 : index
    %c1_24 = arith.constant 1 : index
    %29 = memref.load %arg3[%c1_23, %c1_24] : memref<3x4xf32, #tpu.memory_space<smem>>
    %30 = vector.broadcast %29 : f32 to vector<2x128xf32>
    %31 = arith.mulf %3, %30 : vector<2x128xf32>
    %32 = arith.addf %28, %31 : vector<2x128xf32>
    %c1_25 = arith.constant 1 : index
    %c2_26 = arith.constant 2 : index
    %33 = memref.load %arg3[%c1_25, %c2_26] : memref<3x4xf32, #tpu.memory_space<smem>>
    %34 = vector.broadcast %33 : f32 to vector<2x128xf32>
    %35 = arith.mulf %5, %34 : vector<2x128xf32>
    %36 = arith.addf %32, %35 : vector<2x128xf32>
    %c1_27 = arith.constant 1 : index
    %c3_28 = arith.constant 3 : index
    %37 = memref.load %arg3[%c1_27, %c3_28] : memref<3x4xf32, #tpu.memory_space<smem>>
    %38 = vector.broadcast %37 : f32 to vector<2x128xf32>
    %39 = arith.mulf %7, %38 : vector<2x128xf32>
    %40 = arith.addf %36, %39 : vector<2x128xf32>
    %c1_29 = arith.constant 1 : index
    %41 = memref.load %arg4[%c1_29] : memref<3xf32, #tpu.memory_space<smem>>
    %42 = vector.broadcast %41 : f32 to vector<2x128xf32>
    %43 = arith.addf %40, %42 : vector<2x128xf32>
    %c2_30 = arith.constant 2 : index
    %c0_31 = arith.constant 0 : index
    %44 = memref.load %arg3[%c2_30, %c0_31] : memref<3x4xf32, #tpu.memory_space<smem>>
    %45 = vector.broadcast %44 : f32 to vector<2x128xf32>
    %46 = arith.mulf %1, %45 : vector<2x128xf32>
    %c2_32 = arith.constant 2 : index
    %c1_33 = arith.constant 1 : index
    %47 = memref.load %arg3[%c2_32, %c1_33] : memref<3x4xf32, #tpu.memory_space<smem>>
    %48 = vector.broadcast %47 : f32 to vector<2x128xf32>
    %49 = arith.mulf %3, %48 : vector<2x128xf32>
    %50 = arith.addf %46, %49 : vector<2x128xf32>
    %c2_34 = arith.constant 2 : index
    %c2_35 = arith.constant 2 : index
    %51 = memref.load %arg3[%c2_34, %c2_35] : memref<3x4xf32, #tpu.memory_space<smem>>
    %52 = vector.broadcast %51 : f32 to vector<2x128xf32>
    %53 = arith.mulf %5, %52 : vector<2x128xf32>
    %54 = arith.addf %50, %53 : vector<2x128xf32>
    %c2_36 = arith.constant 2 : index
    %c3_37 = arith.constant 3 : index
    %55 = memref.load %arg3[%c2_36, %c3_37] : memref<3x4xf32, #tpu.memory_space<smem>>
    %56 = vector.broadcast %55 : f32 to vector<2x128xf32>
    %57 = arith.mulf %7, %56 : vector<2x128xf32>
    %58 = arith.addf %54, %57 : vector<2x128xf32>
    %c2_38 = arith.constant 2 : index
    %59 = memref.load %arg4[%c2_38] : memref<3xf32, #tpu.memory_space<smem>>
    %60 = vector.broadcast %59 : f32 to vector<2x128xf32>
    %61 = arith.addf %58, %60 : vector<2x128xf32>
    %62 = arith.maximumf %25, %43 : vector<2x128xf32>
    %63 = arith.maximumf %62, %61 : vector<2x128xf32>
    %64 = arith.subf %25, %63 : vector<2x128xf32>
    %65 = math.exp %64 : vector<2x128xf32>
    %66 = arith.subf %43, %63 : vector<2x128xf32>
    %67 = math.exp %66 : vector<2x128xf32>
    %68 = arith.subf %61, %63 : vector<2x128xf32>
    %69 = math.exp %68 : vector<2x128xf32>
    %70 = arith.addf %65, %67 : vector<2x128xf32>
    %71 = arith.addf %70, %69 : vector<2x128xf32>
    %72 = tpu.reciprocal %71 {approx = true} : vector<2x128xf32> -> vector<2x128xf32>
    %73 = arith.mulf %65, %72 : vector<2x128xf32>
    %74 = arith.mulf %67, %72 : vector<2x128xf32>
    %75 = arith.mulf %69, %72 : vector<2x128xf32>
    %c0_39 = arith.constant 0 : index
    %c0_40 = arith.constant 0 : index
    %c0_41 = arith.constant 0 : index
    %c0_42 = arith.constant 0 : index
    %76 = vector.load %arg5[%c0_39, %c0_40, %c0_41, %c0_42] : memref<1x3x2x128xf32, #tpu.memory_space<vmem>>, vector<1x1x2x128xf32>
    %77 = vector.shape_cast %76 : vector<1x1x2x128xf32> to vector<2x128xf32>
    %78 = vector.shape_cast %73 : vector<2x128xf32> to vector<1x1x2x128xf32>
    tpu.vector_store %arg5[%c0_39, %c0_40, %c0_41, %c0_42], %78 {strides = array<i32>} : memref<1x3x2x128xf32, #tpu.memory_space<vmem>>, vector<1x1x2x128xf32>,
    %c0_43 = arith.constant 0 : index
    %c1_44 = arith.constant 1 : index
    %c0_45 = arith.constant 0 : index
    %c0_46 = arith.constant 0 : index
    %79 = vector.load %arg5[%c0_43, %c1_44, %c0_45, %c0_46] : memref<1x3x2x128xf32, #tpu.memory_space<vmem>>, vector<1x1x2x128xf32>
    %80 = vector.shape_cast %79 : vector<1x1x2x128xf32> to vector<2x128xf32>
    %81 = vector.shape_cast %74 : vector<2x128xf32> to vector<1x1x2x128xf32>
    tpu.vector_store %arg5[%c0_43, %c1_44, %c0_45, %c0_46], %81 {strides = array<i32>} : memref<1x3x2x128xf32, #tpu.memory_space<vmem>>, vector<1x1x2x128xf32>,
    %c0_47 = arith.constant 0 : index
    %c2_48 = arith.constant 2 : index
    %c0_49 = arith.constant 0 : index
    %c0_50 = arith.constant 0 : index
    %82 = vector.load %arg5[%c0_47, %c2_48, %c0_49, %c0_50] : memref<1x3x2x128xf32, #tpu.memory_space<vmem>>, vector<1x1x2x128xf32>
    %83 = vector.shape_cast %82 : vector<1x1x2x128xf32> to vector<2x128xf32>
    %84 = vector.shape_cast %75 : vector<2x128xf32> to vector<1x1x2x128xf32>
    tpu.vector_store %arg5[%c0_47, %c2_48, %c0_49, %c0_50], %84 {strides = array<i32>} : memref<1x3x2x128xf32, #tpu.memory_space<vmem>>, vector<1x1x2x128xf32>,
    return
  }
  func.func @transform_0(%arg0: i32, %arg1: i32) -> (i32, i32, i32, i32) {
    %c0_i32 = arith.constant 0 : i32
    %c0_i32_0 = arith.constant 0 : i32
    %c0_i32_1 = arith.constant 0 : i32
    return %arg0, %c0_i32, %arg1, %c0_i32_0 : i32, i32, i32, i32
  }
  func.func @transform_1(%arg0: i32, %arg1: i32) -> (i32, i32) {
    %c0_i32 = arith.constant 0 : i32
    %c0_i32_0 = arith.constant 0 : i32
    %c0_i32_1 = arith.constant 0 : i32
    return %c0_i32, %c0_i32_0 : i32, i32
  }
  func.func @transform_2(%arg0: i32, %arg1: i32) -> i32 {
    %c0_i32 = arith.constant 0 : i32
    %c0_i32_0 = arith.constant 0 : i32
    return %c0_i32 : i32
  }
  func.func @transform_3(%arg0: i32, %arg1: i32) -> (i32, i32, i32, i32) {
    %c0_i32 = arith.constant 0 : i32
    %c0_i32_0 = arith.constant 0 : i32
    %c0_i32_1 = arith.constant 0 : i32
    return %arg0, %c0_i32, %arg1, %c0_i32_0 : i32, i32, i32, i32
  }
}

</mosaic_0001>

<bundles_post_ra>
// kernel: tpu_custom_call.1
= control target key start
LH: loop header
LB: loop body
LE: loop exit
PB: predicated region body
PF: predicated region fallthrough
CT: control target
= control target key end

     0   :  { %8 = vsyncpa [#allocation3], 0  ;;  %s977_s0 = inlined_call_operand.hbm [shape: f32[2,4,2,128], index: 0, kind: input, shape index: {}]   ;;  %s978_s1 = inlined_call_operand.hbm [shape: f32[3,4], index: 1, kind: input, shape index: {}]   ;;  %s979_s2 = inlined_call_operand.vmem [shape: f32[3], index: 2, kind: input, shape index: {}]   ;;  %s980_s3 = inlined_call_operand.hbm [shape: f32[2,3,2,128], index: 3, kind: output, shape index: {}]  }
   0x1   :  { %10 = vsyncpa [#allocation3 + $0x1], 0 }
   0x2   :  { %11 = vsyncpa [#allocation5], 0 }
   0x3   :  { %12 = vsyncpa [#allocation6], 0 }
   0x4   :  { %13 = vsyncpa [#allocation4], 0 }
   0x5   :  { %15 = vsyncpa [#allocation4 + $0x1], 0  ;;  %s748_s12 = smov 0   ;;  %s750_s13 = smov 0  }
   0x6   :  { %s752_s14 = smov 0   ;;  %s754_s15 = smov 0  }
   0x7   :  { %s756_s16 = smov 0   ;;  %s758_s17 = smov 0  }
   0x8 LB: > { %s438_s18 = sadd.s32 4294967295, %s718_s17   ;;  %s439_s19 = sadd.s32 4294967294, %s718_s17   ;;  %s718_s17 = sphi %s758_s17, %s21_s17   ;;  %s714_s16 = sphi %s756_s16, %s1001_s16   ;;  %s710_s15 = sphi %s754_s15, %s1000_s15   ;;  %s706_s14 = sphi %s752_s14, %s999_s14   ;;  %s702_s13 = sphi %s750_s13, %s998_s13   ;;  %s698_s12 = sphi %s748_s12, %s997_s12  }
   0x9   : > { %s42_s20 = sadd.s32 1, %s706_s14  ;;  %p49_p0 = scmp.ne.s32.totalorder %s706_s14, %s702_s13 }
   0xa   : > { %p50_p1 = scmp.eq.s32.totalorder %s718_s17, 0  ;;  %p55_p2 = scmp.ne.s32.totalorder %s702_s13, %s698_s12 }
   0xb   : > { %p786_p3 = scmp.eq.s32.totalorder %s438_s18, 0  ;;  %p123_p4 = scmp.eq.s32.totalorder %s438_s18, 1 }
   0xc   : > { %p51_p5 = por %p50_p1, %p49_p0  ;;  %p129_p6 = scmp.eq.s32.totalorder %s439_s19, 1 }
   0xd   : > { %s985_s21 = scalar_select %p786_p3, 1, 0 }
   0xe   : > { %p792_p7 = por %p786_p3, %p55_p2  ;;  %p796_p8 = por %p123_p4, %p49_p0 }
   0xf   : > { %p800_p9 = por %p129_p6, %p55_p2  ;;  %p440_p10 = scmp.ge.s32.totalorder %s718_s17, 1 }
  0x10   : > { %s986_s22 = scalar_select %p792_p7, 1, 0 }
  0x11   : > { %s987_s23 = scalar_select %p796_p8, 1, 0 }
  0x12   : > { %s988_s24 = scalar_select %p800_p9, 1, 0 }
  0x13   : > { %p136_p11 = scmp.lt.s32.totalorder %s718_s17, 3  ;;  %p504_p1 = scmp.lt.s32.totalorder %s718_s17, 2 }
  0x14   : > { %s158_s28 = sshll.u32 %s979_s2, 4  ;;  %s169_s4 = sand.u32 1, %s706_s14   ;;  %s159_s28 = int_to_ptr.vmem [resolvable:$true] %s158_s28 }
  0x15   : > { %p807_p13 = pnand %p440_p10, %p136_p11  ;;  %p817_p4 = pnand %p504_p1, %p51_p5 }
  0x16   : > { %s33_s5 = sadd.s32 1, %s714_s16  ;;  %s570_s8 = scalar_lea.hbm %s978_s1, 64 }
  0x17   : > { %p487_p0 = pneg %p807_p13  ;;  %p571_p5 = scmp.ne.s32.totalorder %s978_s1, %s570_s8 }
  0x18   : > { %p577_p1 = scmp.lt.u32.totalorder %s570_s8, %s978_s1 }
  0x19   : > { %p823_p2 = pnand %p487_p0, %p786_p3 }
  0x1b   : > { %p572_p6 = pneg %p823_p2 }
  0x1d   : > { %p573_p10 = pnand %p572_p6, %p571_p5 }
  0x1f   : > { %p574_p11 = pneg %p573_p10 }
  0x21   : > { %p579_p0 = pnand %p577_p1, %p574_p11 }
  0x23   : > { %582 = shalt.err (!%p579_p0)
}
  0x24   : > { %s720_s19 = smov [#allocation7]   ;;  %s583_s6 = scalar_lea.vmem %s159_s28, 16 }
  0x25   : > { %490 = dma.hbm_to_smem (!%p823_p2), %s978_s1, 64, %s720_s19, [#allocation5]  }
  0x26   : > { %p584_p12 = scmp.ne.s32.totalorder %s159_s28, %s583_s6  ;;  %p591_p3 = scmp.lt.s32.totalorder %s159_s28, %s159_s28 }
  0x27   : > { %p592_p5 = scmp.lt.s32.totalorder %s583_s6, %s583_s6 }
  0x28   : > { %p586_p9 = pnand %p584_p12, %p572_p6 }
  0x29   : > { %p593_p10 = por %p592_p5, %p591_p3 }
  0x2a   : > { %p587_p8 = pneg %p586_p9 }
  0x2c   : > { %p594_p7 = pnand %p593_p10, %p587_p8 }
  0x2e   : > { %597 = shalt.err (!%p594_p7)
}
  0x2f   : > { %s721_s7 = smov [#allocation8]   ;;  %p35_p11 = scmp.ge.s32.totalorder %s33_s5, 2 }
  0x30   : > { %493 = dma.vmem_to_smem (!%p823_p2), %s159_s28, 16, %s721_s7, [#allocation6]  }
  0x31   : > { %s444_s8 = sshll.u32 %s169_s4, 3  ;;  %s472_s9 = sshll.u32 %s714_s16, 7 }
  0x32   : > { %s1003_s5 = smov (%p35_p11, %s33_s5), 0  ;;  %s855_s30 = scalar_lea.hbm %s977_s0, %s472_s9 }
  0x33   : > { %s37_s18 = ssub.s32 %s714_s16, %s1003_s5  ;;  %s173_s19 = scalar_lea.vmem [#allocation2], %s444_s8 }
  0x34   : > { %s181_s28 = sshll.u32 %s173_s19, 4  ;;  %p40_p3 = scmp.eq.s32.totalorder %s37_s18, 0  ;;  %s859_s28 = int_to_ptr.vmem [resolvable:$true] %s181_s28 }
  0x35   : > { %s868_s27 = scalar_lea.sflag [#allocation3], %s169_s4  ;;  %s598_s6 = scalar_lea.hbm %s855_s30, 128 }
  0x36   : > { %s864_s26 = scalar_select %p40_p3, %s706_s14, %s42_s20  }
  0x37   : > { %p599_p7 = scmp.ne.s32.totalorder %s855_s30, %s598_s6  ;;  %p600_p8 = pneg %p817_p4 }
  0x38   : > { %s603_s9 = scalar_lea.hbm %s977_s0, 256  ;;  %p604_p2 = scmp.lt.u32.totalorder %s855_s30, %s977_s0 }
  0x39   : > { %p601_p9 = pnand %p600_p8, %p599_p7  ;;  %p605_p6 = scmp.lt.u32.totalorder %s603_s9, %s598_s6 }
  0x3a   : > { %p607_p0 = scmp.lt.u32.totalorder %s598_s6, %s855_s30 }
  0x3b   : > { %p602_p12 = pneg %p601_p9  ;;  %p606_p1 = por %p605_p6, %p604_p2 }
  0x3d   : > { %p608_p5 = por %p607_p0, %p606_p1 }
  0x3f   : > { %p609_p10 = pnand %p608_p5, %p602_p12 }
  0x41   : > { %612 = shalt.err (!%p609_p10)
}
  0x42   : > { %s613_s20 = scalar_lea.vmem %s859_s28, 128  ;;  %s722_s4 = smov [#allocation2]  }
  0x43   : > { %p614_p11 = scmp.ne.s32.totalorder %s859_s28, %s613_s20  ;;  %s618_s18 = sshll.u32 %s722_s4, 4  ;;  %s619_s18 = int_to_ptr.vmem [resolvable:$false] %s618_s18 }
  0x44   : > { %s620_s19 = scalar_lea.vmem %s619_s18, 256  ;;  %p621_p9 = scmp.lt.s32.totalorder %s859_s28, %s619_s18 }
  0x45   : > { %p616_p3 = pnand %p614_p11, %p600_p8  ;;  %p622_p2 = scmp.lt.s32.totalorder %s620_s19, %s613_s20 }
  0x47   : > { %p617_p7 = pneg %p616_p3  ;;  %p623_p6 = por %p622_p2, %p621_p9 }
  0x49   : > { %p624_p1 = pnand %p623_p6, %p617_p7 }
  0x4b   : > { %627 = shalt.err (!%p624_p1)
}
  0x4c   : > { %s723_s6 = smov 32   ;;  %s724_s7 = smov 2  }
  0x4d   : > { %497 = dma.hbm_to_vmem [thread:$0]  (!%p817_p4), %s855_s30, 128, %s859_s28, %s868_s27, %s723_s6, %s723_s6, %s724_s7  }
  0x4e   : > { %193 = sbr.rel (%p807_p13) target bundleno = 166 (0xa6), region = 32  ;;  %s899_s8 = sand.u32 (!%p807_p13), 1, %s702_s13  }
  0x4f   : > { %s448_s9 = sshll.u32 (!%p807_p13), %s899_s8, 3  ;;  %s196_s10 = scalar_lea.sflag (!%p807_p13), [#allocation3], %s899_s8 }
  0x50   : > { %s199_s11 = scalar_lea.vmem (!%p807_p13), [#allocation2], %s448_s9  ;;  %p992_p8 = scmp.ne.s32.totalorder (!%p807_p13), %s986_s22, 0 }
  0x55   : > { %681 = dma.done.wait (%p992_p8), %s196_s10, 128  }
  0x56   : > { %683 = vsyncadd (%p992_p8), %s196_s10, 4294967168  ;;  %p993_p12 = scmp.ne.s32.totalorder %s985_s21, 0 }
  0x58   : > { %685 = dma.done.wait (%p993_p12), [#allocation5], 64  }
  0x59   : > { %687 = vsyncadd (%p993_p12), [#allocation5], 4294967232 }
  0x5a   : > { %689 = dma.done.wait (%p993_p12), [#allocation6], 16  }
  0x5b   : > { %691 = vsyncadd (%p993_p12), [#allocation6], 4294967280 }
  0x5c   : > { %212 = sfence }
  0x5d   : > { %s238_s25 = sld [smem:[#allocation7]]  ;;  %s454_s29 = sld [smem:[#allocation7 + $0x1]]  ;;  %v231_v0 = vld [vmem:[%s199_s11] sm:$0x3]  ;;  %v451_v1 = vld [vmem:[%s199_s11 + $0x2] sm:$0x3] }
  0x5e   : > { %s455_s30 = sld [smem:[#allocation7 + $0x2]]  ;;  %s456_s28 = sld [smem:[#allocation7 + $0x3]]  ;;  %v452_v2 = vld [vmem:[%s199_s11 + $0x4] sm:$0x3]  ;;  %v453_v3 = vld [vmem:[%s199_s11 + $0x6] sm:$0x3] }
  0x5f   : > { %s457_s22 = sld [smem:[#allocation7 + $0x80]]  ;;  %s458_s27 = sld [smem:[#allocation7 + $0x81]] }
  0x60   : > { %s459_s20 = sld [smem:[#allocation7 + $0x82]]  ;;  %s915_s4 = sld [smem:[#allocation8]] }
  0x61   : > { %s460_s18 = sld [smem:[#allocation7 + $0x83]]  ;;  %s462_s19 = sld [smem:[#allocation7 + $0x100]] }
  0x62   : > { %s463_s6 = sld [smem:[#allocation7 + $0x101]]  ;;  %s464_s21 = sld [smem:[#allocation7 + $0x102]] }
  0x63   : > { %v239_v4 = vstv %s238_s25  ;;  %v242_v6 = vstv %s454_s29  ;;  %s465_s7 = sld [smem:[#allocation7 + $0x103]]  ;;  %s917_s9 = sld [smem:[#allocation8 + $0x1]] }
  0x64   : > { %v240_v5 = vmul.f32 %v239_v4, %v231_v0  ;;  %v243_v7 = vmul.f32 %v451_v1, %v242_v6  ;;  %v246_v8 = vstv %s455_s30  ;;  %v250_v9 = vstv %s456_s28  ;;  %s466_s10 = sld [smem:[#allocation8 + $0x2]]  ;;  %s473_s11 = smul.u32 6, %s899_s8 }
  0x65   : > { %v247_v10 = vmul.f32 %v452_v2, %v246_v8  ;;  %v251_v11 = vmul.f32 %v453_v3, %v250_v9  ;;  %v257_v12 = vstv %s457_s22  ;;  %v260_v15 = vstv %s458_s27  ;;  %s474_s30 = smul.u32 96, %s710_s15  ;;  %p994_p4 = scmp.ne.s32.totalorder %s987_s23, 0 }
  0x66   : > { %v244_v13 = vadd.f32 %v243_v7, %v240_v5  ;;  %v258_v14 = vmul.f32 %v257_v12, %v231_v0  ;;  %v264_v16 = vstv %s459_s20  ;;  %v261_v17 = vmul.f32 %v451_v1, %v260_v15  ;;  %s230_s25 = scalar_lea.vmem [#allocation9], %s473_s11  ;;  %s315_s20 = scalar_lea.sflag [#allocation4], %s899_s8 }
  0x67   : > { %v265_v18 = vmul.f32 %v452_v2, %v264_v16  ;;  %v268_v19 = vstv %s460_s18  ;;  %v275_v22 = vstv %s462_s19  ;;  %v254_v29 = vstv %s915_s4  ;;  %s329_s29 = sshll.u32 %s230_s25, 4  ;;  %s928_s27 = scalar_lea.hbm %s980_s3, %s474_s30  ;;  %s923_s29 = int_to_ptr.vmem [resolvable:$true] %s329_s29 }
  0x68   : > { %v248_v20 = vadd.f32 %v247_v10, %v244_v13  ;;  %v269_v21 = vmul.f32 %v453_v3, %v268_v19  ;;  %v278_v23 = vstv %s463_s6  ;;  %v262_v24 = vadd.f32 %v261_v17, %v258_v14  ;;  %s628_s4 = scalar_lea.vmem %s923_s29, 96  ;;  %s725_s15 = smov [#allocation9]  }
  0x69   : > { %v276_v25 = vmul.f32 %v275_v22, %v231_v0  ;;  %v279_v26 = vmul.f32 %v451_v1, %v278_v23  ;;  %v282_v27 = vstv %s464_s21  ;;  %v286_v31 = vstv %s465_s7  ;;  %p629_p13 = scmp.ne.s32.totalorder %s923_s29, %s628_s4  ;;  %s632_s18 = sshll.u32 %s725_s15, 4  ;;  %s633_s18 = int_to_ptr.vmem [resolvable:$false] %s632_s18 }
  0x6a   : > { %v252_v28 = vadd.f32 %v251_v11, %v248_v20  ;;  %v283_v30 = vmul.f32 %v452_v2, %v282_v27  ;;  %v266_v32 = vadd.f32 %v265_v18, %v262_v24  ;;  %v287_v34 = vmul.f32 %v453_v3, %v286_v31  ;;  %s634_s19 = scalar_lea.vmem %s633_s18, 192  ;;  %p635_p10 = scmp.lt.s32.totalorder %s923_s29, %s633_s18 }
  0x6b   : > { %v280_v33 = vadd.f32 %v279_v26, %v276_v25  ;;  %v272_v35 = vstv %s917_s9  ;;  %v290_v39 = vstv %s466_s10  ;;  %p630_p0 = pnand %p629_p13, %p994_p4  ;;  %p636_p11 = scmp.lt.s32.totalorder %s634_s19, %s628_s4 }
  0x6c   : > { %v255_v36 = vadd.f32 %v254_v29, %v252_v28  ;;  %v270_v37 = vadd.f32 %v269_v21, %v266_v32 }
  0x6d   : > { %v284_v38 = vadd.f32 %v283_v30, %v280_v33  ;;  %p631_p5 = pneg %p630_p0  ;;  %p637_p3 = por %p636_p11, %p635_p10 }
  0x6e   : > { %v273_v40 = vadd.f32 %v272_v35, %v270_v37 }
  0x6f   : > { %v288_v41 = vadd.f32 %v287_v34, %v284_v38  ;;  %p638_p7 = pnand %p637_p3, %p631_p5 }
  0x70   : > { %v292_v43 = vmax.f32 %v255_v36, %v273_v40 }
  0x71   : > { %v291_v42 = vadd.f32 %v290_v39, %v288_v41 }
  0x73   : > { %v293_v44 = vmax.f32 %v292_v43, %v291_v42 }
  0x75   : > { %v294_v45 = vsub.f32 %v255_v36, %v293_v44  ;;  %v297_v46 = vsub.f32 %v273_v40, %v293_v44  ;;  %v300_v47 = vsub.f32 %v291_v42, %v293_v44 }
  0x77   : > { %v295_v48 = vmul.f32 1.442695, %v294_v45  ;;  %v298_v49 = vmul.f32 1.442695, %v297_v46  ;;  %v301_v50 = vmul.f32 1.442695, %v300_v47 }
  0x79   : > { %562 = vpow2.f32 %v295_v48 }
  0x7a   : > { %564 = vpow2.f32 %v298_v49 }
  0x7b   : > { %566 = vpow2.f32 %v301_v50 }
  0x83   : > { %v563_v51 = vpop.eup %562 }
  0x84   : > { %v565_v52 = vpop.eup %564 }
  0x85   : > { %v567_v53 = vpop.eup %566  ;;  %v303_v54 = vadd.f32 %v565_v52, %v563_v51 }
  0x87   : > { %v304_v55 = vadd.f32 %v567_v53, %v303_v54 }
  0x89   : > { %568 = vrcp.f32 %v304_v55 }
  0x93   : > { %v569_v56 = vpop.eup %568 }
  0x94   : > { %v306_v57 = vmul.f32 %v569_v56, %v563_v51  ;;  %v307_v58 = vmul.f32 %v569_v56, %v565_v52  ;;  %v308_v59 = vmul.f32 %v569_v56, %v567_v53 }
  0x96   : > { %309 = vst [vmem:[%s230_s25] sm:$0x3] %v306_v57  ;;  %467 = vst [vmem:[%s230_s25 + $0x2] sm:$0x3] %v307_v58 }
  0x97   : > { %468 = vst [vmem:[%s230_s25 + $0x4] sm:$0x3] %v308_v59 }
  0x98   : > { %641 = shalt.err (!%p638_p7)
}
  0x99   : > { %s642_s6 = scalar_lea.hbm %s928_s27, 96  ;;  %s646_s9 = scalar_lea.hbm %s980_s3, 192 }
  0x9a   : > { %p643_p9 = scmp.ne.s32.totalorder %s928_s27, %s642_s6  ;;  %p647_p1 = scmp.lt.u32.totalorder %s928_s27, %s980_s3 }
  0x9b   : > { %p648_p8 = scmp.lt.u32.totalorder %s646_s9, %s642_s6  ;;  %p650_p13 = scmp.lt.u32.totalorder %s642_s6, %s928_s27 }
  0x9c   : > { %p644_p2 = pnand %p643_p9, %p994_p4 }
  0x9d   : > { %p649_p12 = por %p648_p8, %p647_p1 }
  0x9e   : > { %p645_p6 = pneg %p644_p2 }
  0x9f   : > { %p651_p0 = por %p650_p13, %p649_p12 }
  0xa1   : > { %p652_p5 = pnand %p651_p0, %p645_p6 }
  0xa3   : > { %655 = shalt.err (!%p652_p5)
}
  0xa4   : > { %s726_s25 = smov 32   ;;  %s727_s30 = smov 2  }
  0xa5   : > { %485 = dma.vmem_to_hbm [thread:$0]  (%p994_p4), %s923_s29, 96, %s928_s27, %s315_s20, %s726_s25, %s726_s25, %s727_s30  }
  0xa6 PF: > { %s344_s28 = sand.u32 1, %s698_s12   ;;  %p995_p10 = scmp.ne.s32.totalorder %s988_s24, 0 }
  0xa7   : > { %p996_p11 = scmp.ge.s32.totalorder %s718_s17, 2  ;;  %s345_s22 = scalar_lea.sflag [#allocation4], %s344_s28 }
  0xa9   : > { %p499_p3 = pnand %p996_p11, %p995_p10 }
  0xab   : > { %693 = dma.done.wait (!%p499_p3), %s345_s22, 96  }
  0xac   : > { %695 = vsyncadd (!%p499_p3), %s345_s22, 4294967200  ;;  %s21_s17 = sadd.s32 1, %s718_s17   ;;  %s997_s12 = smov %s702_s13 }
  0xad   : > { %p18_p7 = scmp.ge.s32.totalorder %s21_s17, 4   ;;  %s998_s13 = smov %s706_s14 }
  0xae   : > { %s999_s14 = smov %s864_s26  ;;  %s1000_s15 = smov %s714_s16 }
  0xaf   : > { %s1001_s16 = smov %s1003_s5  ;;  %20 = sbr.rel (!%p18_p7) target bundleno = 8 (0x8), region = 92 }
  0xb6   :  { %350 = vsyncpa [#allocation3], 1 }
  0xb7   :  { %352 = vsyncpa [#allocation3 + $0x1], 1 }
  0xb8   :  { %353 = vsyncpa [#allocation4], 1 }
  0xb9   :  { %355 = vsyncpa [#allocation4 + $0x1], 1 }
  0xba   :  { %356 = vsyncpa [#allocation5], 1 }
  0xbb   :  { %358 = vsyncpa [#allocation5 + $0x1], 1 }
  0xbc   :  { %359 = vsyncpa [#allocation6], 1 }
  0xbd   :  { %361 = vsyncpa [#allocation6 + $0x1], 1 }

</bundles_post_ra>
